<compile_context>
chip_gen: v5e
topology: v5e:2x2
jax: 0.10.0
libtpu: 0.0.40
codegen_flags: <defaults>
</compile_context>

<pallas_src>
import functools

import jax
import jax.numpy as jnp
from jax.experimental import pallas as pl
from jax.experimental.pallas import tpu as pltpu


def _round_up(x, m):
    return ((x + m - 1) // m) * m


def _cdiv(a, b):
    return -(-a // b)


def _tpu_kind():
    try:
        return jax.devices()[0].device_kind.lower()
    except Exception:
        return ""


def _is_older_gen(kind):
    # v5e / v6e: 128 MiB VMEM, one TensorCore per chip.
    return ("v5" in kind) or ("v6" in kind)


def _pad_dim(d, prefer_256):
    # v6e/v7x MXUs are 2x256x256: 256-granular K/N tiles fill the systolic
    # array.  v5e (4x128x128) is already optimal at 128, and small dims only
    # need lane-dense 128 padding.
    if prefer_256 and d >= 256:
        return _round_up(d, 256)
    return _round_up(d, 128)


# --------------------------------------------------------------------------
# Kernel
# --------------------------------------------------------------------------
def _fused_mlp_kernel(*refs, num_layers):
    """Fused MLP on one VMEM-resident batch tile.

    refs = (x_ref, w_0, b_0, w_1, b_1, ..., w_{L-1}, b_{L-1}, o_ref)
      x_ref : (tm, D0_pad)       bf16  (MXU-native input type)
      w_l   : (Dl_pad, Dl1_pad)  bf16
      b_l   : (1, Dl1_pad)       f32   (broadcasts over rows)
      o_ref : (tm, DL_pad)       f32   (lane-dense: DL_pad % 128 == 0)
    """
    x_ref = refs[0]
    o_ref = refs[1 + 2 * num_layers]

    h = x_ref[...]                                    # bf16, no cast needed
    for layer in range(num_layers):
        w = refs[1 + 2 * layer][...]
        b = refs[2 + 2 * layer][...]
        # bf16 inputs to the MXU, explicit f32 accumulation.
        acc = jnp.dot(h.astype(jnp.bfloat16), w,
                      preferred_element_type=jnp.float32)
        acc = acc + b                                 # f32 bias add on the VPU
        if layer < num_layers - 1:
            acc = jnp.maximum(acc, 0.0)               # ReLU on all but last layer
        h = acc
    o_ref[...] = h.astype(o_ref.dtype)


# --------------------------------------------------------------------------
# One-time parameter preparation (hoisted out of the forward pass)
# --------------------------------------------------------------------------
def prepare_mlp_params(params):
    """Pad every feature dim to the MXU-friendly granularity and cast weights
    to bf16 ONCE.  Returns a dict consumed by mlp_forward."""
    dims = [params[0][0].shape[0]] + [w.shape[1] for (w, _) in params]
    prefer_256 = not _is_older_gen(_tpu_kind())
    pdims = [_pad_dim(d, prefer_256) for d in dims]

    layers = []
    for l, (w, b) in enumerate(params):
        k, n = w.shape
        w_p = jnp.pad(w, ((0, pdims[l] - k), (0, pdims[l + 1] - n)))
        b_p = jnp.pad(b, (0, pdims[l + 1] - n))
        layers.append((w_p.astype(jnp.bfloat16),
                       b_p.astype(jnp.float32).reshape(1, pdims[l + 1])))
    layers = jax.block_until_ready(layers)            # materialize once
    return {"layers": layers, "dims": dims, "pdims": pdims}


# --------------------------------------------------------------------------
# Forward
# --------------------------------------------------------------------------
def mlp_forward(prepared, x, *, block_m=None):
    """prepared: output of prepare_mlp_params; x: (M, input_dim) f32."""
    layers = prepared["layers"]
    dims, pdims = prepared["dims"], prepared["pdims"]
    num_layers = len(layers)
    M, in_dim = x.shape
    assert in_dim == dims[0]

    kind = _tpu_kind()
    older = _is_older_gen(kind)

    if block_m is None:
        # Bigger batch tiles amortize per-grid-step overhead on 128 MiB parts;
        # stay <= 512 on v7x (64 MiB VMEM).
        block_m = 1024 if older else 512
    vmem_limit = (100 << 20) if older else (48 << 20)

    # Balanced batch tiles: avoid a nearly-empty trailing tile when M is just
    # above block_m, and give >=2 grid steps on dual-TensorCore parts.
    num_tiles = max(1, _cdiv(M, block_m))
    if (not older) and M > 8 and num_tiles < 2:
        num_tiles = 2
    tm = _round_up(_cdiv(M, num_tiles), 8)

    # VMEM budget: resident weights (+biases) x buffer count + double-buffered
    # x / out tiles + live intermediate activation.  Shrink tm if needed.
    def vmem_bytes(tm_, wbuf):
        b = 0
        for l in range(num_layers):
            b += wbuf * pdims[l] * pdims[l + 1] * 2   # bf16 weights
            b += wbuf * pdims[l + 1] * 4              # f32 bias row
        b += 2 * tm_ * pdims[0] * 2                   # x, double buffered, bf16
        b += 2 * tm_ * pdims[-1] * 4                  # out, double buffered, f32
        b += tm_ * max(pdims) * 4                     # intermediate activation
        return b

    budget = int(vmem_limit * 0.85)
    while tm > 8 and vmem_bytes(tm, 2) > budget:
        tm = max(8, _round_up(tm // 2, 8))
    if vmem_bytes(8, 1) > budget:
        # TODO(synk): resident weights alone exceed the VMEM budget; add a K/N
        # tiling grid axis (or pltpu.emit_pipeline inside the body) to stream
        # weight tiles instead of keeping them resident.
        raise ValueError("MLP weights too large to keep VMEM-resident; "
                         "weight streaming not implemented.")

    m_pad = _round_up(M, tm)
    grid = (m_pad // tm,)

    # x cast to bf16 once in the wrapper (halves x DMA / x VMEM).
    x_p = jnp.pad(x, ((0, m_pad - M), (0, pdims[0] - in_dim))).astype(jnp.bfloat16)

    flat_inputs = [x_p]
    for (w_p, b_p) in layers:
        flat_inputs += [w_p, b_p]

    out_dim, out_pad = dims[-1], pdims[-1]
    kernel = functools.partial(_fused_mlp_kernel, num_layers=num_layers)

    flops = 2 * m_pad * sum(pdims[l] * pdims[l + 1] for l in range(num_layers))
    bytes_accessed = (
        m_pad * pdims[0] * 2
        + sum(pdims[l] * pdims[l + 1] * 2 + pdims[l + 1] * 4
              for l in range(num_layers))
        + m_pad * out_pad * 4)
    cost = pl.CostEstimate(flops=flops, transcendentals=0,
                           bytes_accessed=bytes_accessed)

    def build(single_buffer_weights):
        wspec_kwargs = {}
        if single_buffer_weights and hasattr(pl, "Buffered"):
            # Constant-index (revisited) weight/bias blocks don't need the
            # default double buffering -> halves resident-weight VMEM.
            wspec_kwargs = dict(pipeline_mode=pl.Buffered(1))
        in_specs = [pl.BlockSpec((tm, pdims[0]), lambda i: (i, 0))]
        for l in range(num_layers):
            in_specs.append(pl.BlockSpec((pdims[l], pdims[l + 1]),
                                         lambda i: (0, 0), **wspec_kwargs))
            in_specs.append(pl.BlockSpec((1, pdims[l + 1]),
                                         lambda i: (0, 0), **wspec_kwargs))
        return pl.pallas_call(
            kernel,
            out_shape=jax.ShapeDtypeStruct((m_pad, out_pad), jnp.float32),
            grid=grid,
            in_specs=in_specs,
            out_specs=pl.BlockSpec((tm, out_pad), lambda i: (i, 0)),
            compiler_params=pltpu.CompilerParams(
                dimension_semantics=("parallel",),    # batch tiles independent
                vmem_limit_bytes=vmem_limit),
            cost_estimate=cost,
        )

    try:
        out_p = build(True)(*flat_inputs)
    except Exception:
        # Older jax without BlockSpec pipeline_mode support.
        out_p = build(False)(*flat_inputs)

    return out_p[:M, :out_dim]


# --------------------------------------------------------------------------
# Parameter init (mimics nn.Linear: uniform +-1/sqrt(fan_in))
# --------------------------------------------------------------------------
def init_mlp_params(key, num_layers, input_dim, hidden_dim, output_dim):
    if num_layers < 1:
        raise ValueError("number of layers should be positive!")
    if num_layers == 1:
        shapes = [(input_dim, output_dim)]
    else:
        shapes = [(input_dim, hidden_dim)]
        shapes += [(hidden_dim, hidden_dim)] * (num_layers - 2)
        shapes += [(hidden_dim, output_dim)]

    params = []
    for (fan_in, fan_out) in shapes:
        key, kw, kb = jax.random.split(key, 3)
        bound = 1.0 / jnp.sqrt(fan_in)
        w = jax.random.uniform(kw, (fan_in, fan_out), jnp.float32, -bound, bound)
        b = jax.random.uniform(kb, (fan_out,), jnp.float32, -bound, bound)
        params.append((w, b))
    return params


if __name__ == "__main__":
    num_layers = 3
    batch = 16
    input_dim = 32
    hidden_dim = 64
    output_dim = 16

    key = jax.random.PRNGKey(0)
    key, kx = jax.random.split(key)
    x = jax.random.normal(kx, (batch, input_dim), jnp.float32)

    params = init_mlp_params(key, num_layers, input_dim, hidden_dim, output_dim)
    prepared = prepare_mlp_params(params)   # padding + bf16 cast done ONCE

    out = mlp_forward(prepared, x)
    out = jax.block_until_ready(out)
    assert out.shape == (batch, output_dim)

    # Reference 1: matched precision (bf16 matmul inputs, f32 accumulate).
    h_bf = x
    for i, (w, b) in enumerate(params):
        h_bf = jnp.dot(h_bf.astype(jnp.bfloat16), w.astype(jnp.bfloat16),
                       preferred_element_type=jnp.float32) + b
        if i < len(params) - 1:
            h_bf = jnp.maximum(h_bf, 0.0)
    assert jnp.allclose(out, h_bf, atol=1e-2, rtol=1e-2)

    # Reference 2: pure f32 (original PyTorch semantics); looser tolerance for
    # the intentional bf16 MXU inputs.  NOTE: bf16 weights/activations deviate
    # from the PyTorch f32 forward; gate the cast if full f32 fidelity is
    # required for deeper/wider MLPs.
    h_f32 = x
    for i, (w, b) in enumerate(params):
        h_f32 = h_f32 @ w + b
        if i < len(params) - 1:
            h_f32 = jnp.maximum(h_f32, 0.0)
    assert jnp.allclose(out, h_f32, atol=5e-2, rtol=5e-2)

    print("KERNEL_OK")
</pallas_src>

<mosaic_0001>
module attributes {stable_mosaic.version = 11 : i64} {
  func.func @_fused_mlp_kernel(%arg0: i32, %arg1: memref<8x128xbf16, #tpu.memory_space<vmem>>, %arg2: memref<128x128xbf16, #tpu.memory_space<vmem>>, %arg3: memref<1x128xf32, #tpu.memory_space<vmem>>, %arg4: memref<128x128xbf16, #tpu.memory_space<vmem>>, %arg5: memref<1x128xf32, #tpu.memory_space<vmem>>, %arg6: memref<128x128xbf16, #tpu.memory_space<vmem>>, %arg7: memref<1x128xf32, #tpu.memory_space<vmem>>, %arg8: memref<8x128xf32, #tpu.memory_space<vmem>>) attributes {dimension_semantics = [#tpu.dimension_semantics<parallel>], iteration_bounds = array<i64: 2>, scalar_prefetch = 0 : i64, scratch_operands = 0 : i64, tpu.core_type = #tpu.core_type<tc>, window_params = [{transform_indices = @transform_0, window_bounds = array<i64: 8, 128>}, {pipeline_mode = #tpu.pipeline_mode<synchronous>, transform_indices = @transform_1, window_bounds = array<i64: 128, 128>}, {pipeline_mode = #tpu.pipeline_mode<synchronous>, transform_indices = @transform_2, window_bounds = array<i64: 1, 128>}, {pipeline_mode = #tpu.pipeline_mode<synchronous>, transform_indices = @transform_3, window_bounds = array<i64: 128, 128>}, {pipeline_mode = #tpu.pipeline_mode<synchronous>, transform_indices = @transform_4, window_bounds = array<i64: 1, 128>}, {pipeline_mode = #tpu.pipeline_mode<synchronous>, transform_indices = @transform_5, window_bounds = array<i64: 128, 128>}, {pipeline_mode = #tpu.pipeline_mode<synchronous>, transform_indices = @transform_6, window_bounds = array<i64: 1, 128>}, {transform_indices = @transform_7, window_bounds = array<i64: 8, 128>}]} {
    %c0 = arith.constant 0 : index
    %c0_0 = arith.constant 0 : index
    %0 = vector.load %arg1[%c0, %c0_0] : memref<8x128xbf16, #tpu.memory_space<vmem>>, vector<8x128xbf16>
    %c0_1 = arith.constant 0 : index
    %c0_2 = arith.constant 0 : index
    %1 = vector.load %arg2[%c0_1, %c0_2] : memref<128x128xbf16, #tpu.memory_space<vmem>>, vector<128x128xbf16>
    %c0_3 = arith.constant 0 : index
    %c0_4 = arith.constant 0 : index
    %2 = vector.load %arg3[%c0_3, %c0_4] : memref<1x128xf32, #tpu.memory_space<vmem>>, vector<1x128xf32>
    %cst = arith.constant dense<0.000000e+00> : vector<8x128xf32>
    %3 = tpu.matmul %0, %1, %cst {dimension_numbers = #tpu.dot_dimension_numbers<[1], [0], [0], [1], [0, 0, 1, 1], [], []>} : vector<8x128xbf16>, vector<128x128xbf16>, vector<8x128xf32> -> vector<8x128xf32>
    %4 = vector.broadcast %2 : vector<1x128xf32> to vector<8x128xf32>
    %5 = arith.addf %3, %4 : vector<8x128xf32>
    %cst_5 = arith.constant 0.000000e+00 : f32
    %6 = vector.broadcast %cst_5 : f32 to vector<8x128xf32>
    %7 = arith.maximumf %5, %6 : vector<8x128xf32>
    %c0_6 = arith.constant 0 : index
    %c0_7 = arith.constant 0 : index
    %8 = vector.load %arg4[%c0_6, %c0_7] : memref<128x128xbf16, #tpu.memory_space<vmem>>, vector<128x128xbf16>
    %c0_8 = arith.constant 0 : index
    %c0_9 = arith.constant 0 : index
    %9 = vector.load %arg5[%c0_8, %c0_9] : memref<1x128xf32, #tpu.memory_space<vmem>>, vector<1x128xf32>
    %10 = arith.truncf %7 : vector<8x128xf32> to vector<8x128xbf16>
    %cst_10 = arith.constant dense<0.000000e+00> : vector<8x128xf32>
    %11 = tpu.matmul %10, %8, %cst_10 {dimension_numbers = #tpu.dot_dimension_numbers<[1], [0], [0], [1], [0, 0, 1, 1], [], []>} : vector<8x128xbf16>, vector<128x128xbf16>, vector<8x128xf32> -> vector<8x128xf32>
    %12 = vector.broadcast %9 : vector<1x128xf32> to vector<8x128xf32>
    %13 = arith.addf %11, %12 : vector<8x128xf32>
    %cst_11 = arith.constant 0.000000e+00 : f32
    %14 = vector.broadcast %cst_11 : f32 to vector<8x128xf32>
    %15 = arith.maximumf %13, %14 : vector<8x128xf32>
    %c0_12 = arith.constant 0 : index
    %c0_13 = arith.constant 0 : index
    %16 = vector.load %arg6[%c0_12, %c0_13] : memref<128x128xbf16, #tpu.memory_space<vmem>>, vector<128x128xbf16>
    %c0_14 = arith.constant 0 : index
    %c0_15 = arith.constant 0 : index
    %17 = vector.load %arg7[%c0_14, %c0_15] : memref<1x128xf32, #tpu.memory_space<vmem>>, vector<1x128xf32>
    %18 = arith.truncf %15 : vector<8x128xf32> to vector<8x128xbf16>
    %cst_16 = arith.constant dense<0.000000e+00> : vector<8x128xf32>
    %19 = tpu.matmul %18, %16, %cst_16 {dimension_numbers = #tpu.dot_dimension_numbers<[1], [0], [0], [1], [0, 0, 1, 1], [], []>} : vector<8x128xbf16>, vector<128x128xbf16>, vector<8x128xf32> -> vector<8x128xf32>
    %20 = vector.broadcast %17 : vector<1x128xf32> to vector<8x128xf32>
    %21 = arith.addf %19, %20 : vector<8x128xf32>
    %c0_17 = arith.constant 0 : index
    %c0_18 = arith.constant 0 : index
    %22 = vector.load %arg8[%c0_17, %c0_18] : memref<8x128xf32, #tpu.memory_space<vmem>>, vector<8x128xf32>
    tpu.vector_store %arg8[%c0_17, %c0_18], %21 {strides = array<i32>} : memref<8x128xf32, #tpu.memory_space<vmem>>, vector<8x128xf32>,
    return
  }
  func.func @transform_0(%arg0: i32) -> (i32, i32) {
    %c0_i32 = arith.constant 0 : i32
    %c0_i32_0 = arith.constant 0 : i32
    return %arg0, %c0_i32 : i32, i32
  }
  func.func @transform_1(%arg0: i32) -> (i32, i32) {
    %c0_i32 = arith.constant 0 : i32
    %c0_i32_0 = arith.constant 0 : i32
    %c0_i32_1 = arith.constant 0 : i32
    return %c0_i32, %c0_i32_0 : i32, i32
  }
  func.func @transform_2(%arg0: i32) -> (i32, i32) {
    %c0_i32 = arith.constant 0 : i32
    %c0_i32_0 = arith.constant 0 : i32
    %c0_i32_1 = arith.constant 0 : i32
    return %c0_i32, %c0_i32_0 : i32, i32
  }
  func.func @transform_3(%arg0: i32) -> (i32, i32) {
    %c0_i32 = arith.constant 0 : i32
    %c0_i32_0 = arith.constant 0 : i32
    %c0_i32_1 = arith.constant 0 : i32
    return %c0_i32, %c0_i32_0 : i32, i32
  }
  func.func @transform_4(%arg0: i32) -> (i32, i32) {
    %c0_i32 = arith.constant 0 : i32
    %c0_i32_0 = arith.constant 0 : i32
    %c0_i32_1 = arith.constant 0 : i32
    return %c0_i32, %c0_i32_0 : i32, i32
  }
  func.func @transform_5(%arg0: i32) -> (i32, i32) {
    %c0_i32 = arith.constant 0 : i32
    %c0_i32_0 = arith.constant 0 : i32
    %c0_i32_1 = arith.constant 0 : i32
    return %c0_i32, %c0_i32_0 : i32, i32
  }
  func.func @transform_6(%arg0: i32) -> (i32, i32) {
    %c0_i32 = arith.constant 0 : i32
    %c0_i32_0 = arith.constant 0 : i32
    %c0_i32_1 = arith.constant 0 : i32
    return %c0_i32, %c0_i32_0 : i32, i32
  }
  func.func @transform_7(%arg0: i32) -> (i32, i32) {
    %c0_i32 = arith.constant 0 : i32
    %c0_i32_0 = arith.constant 0 : i32
    return %arg0, %c0_i32 : i32, i32
  }
}

module attributes {stable_mosaic.version = 11 : i64} {
  func.func @_fused_mlp_kernel(%arg0: i32, %arg1: memref<8x128xbf16, #tpu.memory_space<vmem>>, %arg2: memref<128x128xbf16, #tpu.memory_space<vmem>>, %arg3: memref<1x128xf32, #tpu.memory_space<vmem>>, %arg4: memref<128x128xbf16, #tpu.memory_space<vmem>>, %arg5: memref<1x128xf32, #tpu.memory_space<vmem>>, %arg6: memref<128x128xbf16, #tpu.memory_space<vmem>>, %arg7: memref<1x128xf32, #tpu.memory_space<vmem>>, %arg8: memref<8x128xf32, #tpu.memory_space<vmem>>) attributes {dimension_semantics = [#tpu.dimension_semantics<parallel>], iteration_bounds = array<i64: 2>, scalar_prefetch = 0 : i64, scratch_operands = 0 : i64, tpu.core_type = #tpu.core_type<tc>, window_params = [{transform_indices = @transform_0, window_bounds = array<i64: 8, 128>}, {pipeline_mode = #tpu.pipeline_mode<synchronous>, transform_indices = @transform_1, window_bounds = array<i64: 128, 128>}, {pipeline_mode = #tpu.pipeline_mode<synchronous>, transform_indices = @transform_2, window_bounds = array<i64: 1, 128>}, {pipeline_mode = #tpu.pipeline_mode<synchronous>, transform_indices = @transform_3, window_bounds = array<i64: 128, 128>}, {pipeline_mode = #tpu.pipeline_mode<synchronous>, transform_indices = @transform_4, window_bounds = array<i64: 1, 128>}, {pipeline_mode = #tpu.pipeline_mode<synchronous>, transform_indices = @transform_5, window_bounds = array<i64: 128, 128>}, {pipeline_mode = #tpu.pipeline_mode<synchronous>, transform_indices = @transform_6, window_bounds = array<i64: 1, 128>}, {transform_indices = @transform_7, window_bounds = array<i64: 8, 128>}]} {
    %c0 = arith.constant 0 : index
    %c0_0 = arith.constant 0 : index
    %0 = vector.load %arg1[%c0, %c0_0] : memref<8x128xbf16, #tpu.memory_space<vmem>>, vector<8x128xbf16>
    %c0_1 = arith.constant 0 : index
    %c0_2 = arith.constant 0 : index
    %1 = vector.load %arg2[%c0_1, %c0_2] : memref<128x128xbf16, #tpu.memory_space<vmem>>, vector<128x128xbf16>
    %c0_3 = arith.constant 0 : index
    %c0_4 = arith.constant 0 : index
    %2 = vector.load %arg3[%c0_3, %c0_4] : memref<1x128xf32, #tpu.memory_space<vmem>>, vector<1x128xf32>
    %cst = arith.constant dense<0.000000e+00> : vector<8x128xf32>
    %3 = tpu.matmul %0, %1, %cst {dimension_numbers = #tpu.dot_dimension_numbers<[1], [0], [0], [1], [0, 0, 1, 1], [], []>} : vector<8x128xbf16>, vector<128x128xbf16>, vector<8x128xf32> -> vector<8x128xf32>
    %4 = vector.broadcast %2 : vector<1x128xf32> to vector<8x128xf32>
    %5 = arith.addf %3, %4 : vector<8x128xf32>
    %cst_5 = arith.constant 0.000000e+00 : f32
    %6 = vector.broadcast %cst_5 : f32 to vector<8x128xf32>
    %7 = arith.maximumf %5, %6 : vector<8x128xf32>
    %c0_6 = arith.constant 0 : index
    %c0_7 = arith.constant 0 : index
    %8 = vector.load %arg4[%c0_6, %c0_7] : memref<128x128xbf16, #tpu.memory_space<vmem>>, vector<128x128xbf16>
    %c0_8 = arith.constant 0 : index
    %c0_9 = arith.constant 0 : index
    %9 = vector.load %arg5[%c0_8, %c0_9] : memref<1x128xf32, #tpu.memory_space<vmem>>, vector<1x128xf32>
    %10 = arith.truncf %7 : vector<8x128xf32> to vector<8x128xbf16>
    %cst_10 = arith.constant dense<0.000000e+00> : vector<8x128xf32>
    %11 = tpu.matmul %10, %8, %cst_10 {dimension_numbers = #tpu.dot_dimension_numbers<[1], [0], [0], [1], [0, 0, 1, 1], [], []>} : vector<8x128xbf16>, vector<128x128xbf16>, vector<8x128xf32> -> vector<8x128xf32>
    %12 = vector.broadcast %9 : vector<1x128xf32> to vector<8x128xf32>
    %13 = arith.addf %11, %12 : vector<8x128xf32>
    %cst_11 = arith.constant 0.000000e+00 : f32
    %14 = vector.broadcast %cst_11 : f32 to vector<8x128xf32>
    %15 = arith.maximumf %13, %14 : vector<8x128xf32>
    %c0_12 = arith.constant 0 : index
    %c0_13 = arith.constant 0 : index
    %16 = vector.load %arg6[%c0_12, %c0_13] : memref<128x128xbf16, #tpu.memory_space<vmem>>, vector<128x128xbf16>
    %c0_14 = arith.constant 0 : index
    %c0_15 = arith.constant 0 : index
    %17 = vector.load %arg7[%c0_14, %c0_15] : memref<1x128xf32, #tpu.memory_space<vmem>>, vector<1x128xf32>
    %18 = arith.truncf %15 : vector<8x128xf32> to vector<8x128xbf16>
    %cst_16 = arith.constant dense<0.000000e+00> : vector<8x128xf32>
    %19 = tpu.matmul %18, %16, %cst_16 {dimension_numbers = #tpu.dot_dimension_numbers<[1], [0], [0], [1], [0, 0, 1, 1], [], []>} : vector<8x128xbf16>, vector<128x128xbf16>, vector<8x128xf32> -> vector<8x128xf32>
    %20 = vector.broadcast %17 : vector<1x128xf32> to vector<8x128xf32>
    %21 = arith.addf %19, %20 : vector<8x128xf32>
    %c0_17 = arith.constant 0 : index
    %c0_18 = arith.constant 0 : index
    %22 = vector.load %arg8[%c0_17, %c0_18] : memref<8x128xf32, #tpu.memory_space<vmem>>, vector<8x128xf32>
    tpu.vector_store %arg8[%c0_17, %c0_18], %21 {strides = array<i32>} : memref<8x128xf32, #tpu.memory_space<vmem>>, vector<8x128xf32>,
    return
  }
  func.func @transform_0(%arg0: i32) -> (i32, i32) {
    %c0_i32 = arith.constant 0 : i32
    %c0_i32_0 = arith.constant 0 : i32
    return %arg0, %c0_i32 : i32, i32
  }
  func.func @transform_1(%arg0: i32) -> (i32, i32) {
    %c0_i32 = arith.constant 0 : i32
    %c0_i32_0 = arith.constant 0 : i32
    %c0_i32_1 = arith.constant 0 : i32
    return %c0_i32, %c0_i32_0 : i32, i32
  }
  func.func @transform_2(%arg0: i32) -> (i32, i32) {
    %c0_i32 = arith.constant 0 : i32
    %c0_i32_0 = arith.constant 0 : i32
    %c0_i32_1 = arith.constant 0 : i32
    return %c0_i32, %c0_i32_0 : i32, i32
  }
  func.func @transform_3(%arg0: i32) -> (i32, i32) {
    %c0_i32 = arith.constant 0 : i32
    %c0_i32_0 = arith.constant 0 : i32
    %c0_i32_1 = arith.constant 0 : i32
    return %c0_i32, %c0_i32_0 : i32, i32
  }
  func.func @transform_4(%arg0: i32) -> (i32, i32) {
    %c0_i32 = arith.constant 0 : i32
    %c0_i32_0 = arith.constant 0 : i32
    %c0_i32_1 = arith.constant 0 : i32
    return %c0_i32, %c0_i32_0 : i32, i32
  }
  func.func @transform_5(%arg0: i32) -> (i32, i32) {
    %c0_i32 = arith.constant 0 : i32
    %c0_i32_0 = arith.constant 0 : i32
    %c0_i32_1 = arith.constant 0 : i32
    return %c0_i32, %c0_i32_0 : i32, i32
  }
  func.func @transform_6(%arg0: i32) -> (i32, i32) {
    %c0_i32 = arith.constant 0 : i32
    %c0_i32_0 = arith.constant 0 : i32
    %c0_i32_1 = arith.constant 0 : i32
    return %c0_i32, %c0_i32_0 : i32, i32
  }
  func.func @transform_7(%arg0: i32) -> (i32, i32) {
    %c0_i32 = arith.constant 0 : i32
    %c0_i32_0 = arith.constant 0 : i32
    return %arg0, %c0_i32 : i32, i32
  }
}

</mosaic_0001>

<bundles_post_ra>
// kernel: tpu_custom_call.1
= control target key start
LH: loop header
LB: loop body
LE: loop exit
PB: predicated region body
PF: predicated region fallthrough
CT: control target
= control target key end

     0   :  { %s1340_s0 = inlined_call_operand.hbm [shape: bf16[16,128], index: 0, kind: input, shape index: {}]   ;;  %s1341_s1 = inlined_call_operand.hbm [shape: bf16[128,128], index: 1, kind: input, shape index: {}]   ;;  %s1342_s2 = inlined_call_operand.vmem [shape: f32[1,128], index: 2, kind: input, shape index: {}]   ;;  %s1343_s3 = inlined_call_operand.hbm [shape: bf16[128,128], index: 3, kind: input, shape index: {}]   ;;  %s1344_s4 = inlined_call_operand.vmem [shape: f32[1,128], index: 4, kind: input, shape index: {}]   ;;  %s1345_s5 = inlined_call_operand.hbm [shape: bf16[128,128], index: 5, kind: input, shape index: {}]   ;;  %s1346_s6 = inlined_call_operand.vmem [shape: f32[1,128], index: 6, kind: input, shape index: {}]   ;;  %s1347_s7 = inlined_call_operand.hbm [shape: f32[16,128], index: 7, kind: output, shape index: {}]  }
   0x1   :  { %1348 = sst [smem:[#allocation15_spill]] %s1341_s1 }
   0x2   :  { %12 = vsyncpa [#allocation3], 0 }
   0x3   :  { %14 = vsyncpa [#allocation3 + $0x1], 0 }
   0x4   :  { %15 = vsyncpa [#allocation6], 0 }
   0x5   :  { %16 = vsyncpa [#allocation9], 0 }
   0x6   :  { %17 = vsyncpa [#allocation4], 0 }
   0x7   :  { %19 = vsyncpa [#allocation4 + $0x1], 0  ;;  %s1171_s24 = smov 0   ;;  %s1173_s25 = smov 0  }
   0x8   :  { %s1175_s26 = smov 0   ;;  %s1177_s27 = smov 0  }
   0x9 LB: > { %s1349_s1 = sld [smem:[#allocation15_spill]]  ;;  %s1195_s8 = sadd.s32 4294967295, %s1124_s27   ;;  %s1124_s27 = sphi %s1177_s27, %s1360_s27   ;;  %s1120_s26 = sphi %s1175_s26, %s1359_s26   ;;  %s1116_s25 = sphi %s1173_s25, %s1358_s25   ;;  %s1112_s24 = sphi %s1171_s24, %s1357_s24  }
   0xa   : > { %p711_p0 = scmp.ge.s32.totalorder %s1124_s27, 1  ;;  %p46_p1 = scmp.eq.s32.totalorder %s1195_s8, 0 }
   0xb   : > { %p208_p2 = scmp.lt.s32.totalorder %s1124_s27, 3  ;;  %s1126_s10 = smov [#allocation5]  }
   0xc   : > { %s221_s11 = sshll.u32 %s1126_s10, 4  ;;  %s236_s14 = sshll.u32 %s1343_s3, 4  ;;  %s222_s11 = int_to_ptr.vmem [resolvable:$true] %s221_s11  ;;  %s237_s14 = int_to_ptr.hbm [resolvable:$true] %s236_s14 }
   0xd   : > { %p1200_p3 = pnand %p711_p0, %p208_p2  ;;  %s253_s18 = sshll.u32 %s1345_s5, 4  ;;  %s254_s18 = int_to_ptr.hbm [resolvable:$true] %s253_s18 }
   0xe   : > { %s1127_s19 = smov [#allocation7]   ;;  %s1128_s21 = smov 64  }
   0xf   : > { %s219_s30 = sshll.u32 %s1349_s1, 4  ;;  %p864_p4 = pneg %p1200_p3  ;;  %s220_s30 = int_to_ptr.hbm [resolvable:$true] %s219_s30 }
  0x10   : > { %s238_s20 = sshll.u32 %s1127_s19, 4  ;;  %s1129_s22 = smov 4   ;;  %s239_s20 = int_to_ptr.vmem [resolvable:$true] %s238_s20 }
  0x11   : > { %p1212_p6 = pnand %p864_p4, %p46_p1  ;;  %s1130_s23 = smov [#allocation8]  }
  0x12   : > { %s255_s28 = sshll.u32 %s1130_s23, 4  ;;  %s710_s29 = sadd.s32 4294967294, %s1124_s27   ;;  %s256_s28 = int_to_ptr.vmem [resolvable:$true] %s255_s28 }
  0x13   : > { %867 = dma.hbm_to_vmem [thread:$0]  (!%p1212_p6), %s220_s30, 1024, %s222_s11, [#allocation6], %s1128_s21, %s1128_s21, %s1129_s22  }
  0x14   : > { %870 = dma.hbm_to_vmem [thread:$0]  (!%p1212_p6), %s237_s14, 1024, %s239_s20, [#allocation6], %s1128_s21, %s1128_s21, %s1129_s22  }
  0x15   : > { %873 = dma.hbm_to_vmem [thread:$0]  (!%p1212_p6), %s254_s18, 1024, %s256_s28, [#allocation9], %s1128_s21, %s1128_s21, %s1129_s22  }
  0x16   : > { %s1227_s10 = sadd.s32 1, %s1124_s27   ;;  %s32_s12 = sadd.s32 1, %s1120_s26 }
  0x17   : > { %s29_s30 = ssub.s32 %s1124_s27, %s1227_s10  ;;  %p39_p7 = scmp.ne.s32.totalorder %s1120_s26, %s1116_s25 }
  0x18   : > { %p30_p8 = scmp.eq.s32.totalorder %s29_s30, 0  ;;  %p40_p9 = scmp.eq.s32.totalorder %s1124_s27, 0 }
  0x19   : > { %p45_p10 = scmp.ne.s32.totalorder %s1116_s25, %s1112_s24  ;;  %p195_p11 = scmp.eq.s32.totalorder %s1195_s8, 1 }
  0x1a   : > { %s1239_s11 = scalar_select %p30_p8, %s1120_s26, %s32_s12  }
  0x1b   : > { %p1243_p12 = por %p46_p1, %p45_p10  ;;  %p1247_p13 = por %p195_p11, %p39_p7 }
  0x1c   : > { %p201_p0 = scmp.eq.s32.totalorder %s710_s29, 1  ;;  %p41_p2 = por %p40_p9, %p39_p7 }
  0x1d   : > { %s272_s15 = sand.u32 1, %s1120_s26   ;;  %p885_p6 = scmp.lt.s32.totalorder %s1124_s27, 2 }
  0x1e   : > { %p1252_p4 = por %p201_p0, %p45_p10  ;;  %s716_s17 = sshll.u32 %s272_s15, 2 }
  0x1f   : > { %s717_s18 = sshll.u32 %s1124_s27, 2  ;;  %s276_s23 = scalar_lea.vmem [#allocation2], %s716_s17 }
  0x20   : > { %s280_s21 = scalar_lea.hbm %s1340_s0, %s717_s18  ;;  %s284_s28 = sshll.u32 %s276_s23, 4  ;;  %s285_s28 = int_to_ptr.vmem [resolvable:$true] %s284_s28 }
  0x21   : > { %s282_s22 = sshll.u32 %s280_s21, 4  ;;  %p1261_p8 = pnand %p885_p6, %p41_p2  ;;  %s283_s22 = int_to_ptr.hbm [resolvable:$true] %s282_s22 }
  0x22   : > { %s273_s12 = scalar_lea.sflag [#allocation3], %s272_s15  ;;  %s1020_s30 = sshra.s32 %s283_s22, 4  ;;  %s1021_s30 = int_to_ptr.hbm [resolvable:$true] %s1020_s30 }
  0x23   : > { %s1022_s1 = scalar_lea.hbm %s1021_s30, 4  ;;  %p1024_p9 = pneg %p1261_p8 }
  0x24   : > { %p1023_p7 = scmp.ne.s32.totalorder %s1021_s30, %s1022_s1  ;;  %s1027_s17 = scalar_lea.hbm %s1340_s0, 8 }
  0x25   : > { %p1028_p0 = scmp.lt.s32.totalorder %s1021_s30, %s1340_s0  ;;  %p1029_p2 = scmp.lt.s32.totalorder %s1027_s17, %s1022_s1 }
  0x26   : > { %p1025_p10 = pnand %p1024_p9, %p1023_p7 }
  0x27   : > { %p1030_p6 = por %p1029_p2, %p1028_p0 }
  0x28   : > { %p1026_p11 = pneg %p1025_p10 }
  0x2a   : > { %p1031_p5 = pnand %p1030_p6, %p1026_p11 }
  0x2c   : > { %1034 = shalt.err (!%p1031_p5)
}
  0x2d   : > { %877 = dma.hbm_to_vmem [thread:$0]  (!%p1261_p8), %s283_s22, 64, %s285_s28, %s273_s12  }
  0x2e   : > { %293 = sbr.rel (%p1200_p3) target bundleno = 492 (0x1ec), region = 48  ;;  %s1278_s15 = sand.u32 (!%p1200_p3), 1, %s1116_s25  }
  0x2f   : > { %s719_s23 = sshll.u32 (!%p1200_p3), %s1278_s15, 2  ;;  %s296_s18 = scalar_lea.sflag (!%p1200_p3), [#allocation3], %s1278_s15 }
  0x30   : > { %s1282_s19 = scalar_lea.vmem (!%p1200_p3), [#allocation2], %s719_s23 }
  0x33   : > { %1095 = dma.done.wait (%p1243_p12), %s296_s18, 64  }
  0x34   : > { %1097 = vsyncadd (%p1243_p12), %s296_s18, 4294967232 }
  0x35   : > { %1099 = dma.done.wait (%p46_p1), [#allocation6], 2048  }
  0x36   : > { %1101 = vsyncadd (%p46_p1), [#allocation6], 4294965248 }
  0x37   : > { %1103 = dma.done.wait (%p46_p1), [#allocation9], 1024  }
  0x38   : > { %1105 = vsyncadd (%p46_p1), [#allocation9], 4294966272  ;;  %v831_v0 = vld [vmem:[#allocation5 + $0x38] sm:$0xff]  ;;  %v830_v1 = vld [vmem:[#allocation5 + $0x30] sm:$0xff]  ;;  %s821_s28 = sshll.u32 %s1195_s8, 3  ;;  %s723_s29 = sshll.u32 %s1278_s15, 3 }
  0x39   : > { %415 = vmatpush.bf16.msra.mxu0 %v831_v0  ;;  %v839_v2 = vld [vmem:[#allocation7 + $0x38] sm:$0xff]  ;;  %v838_v3 = vld [vmem:[#allocation7 + $0x30] sm:$0xff]  ;;  %v829_v4 = vld [vmem:[#allocation5 + $0x28] sm:$0xff]  ;;  %s606_s17 = scalar_lea.hbm %s1347_s7, %s821_s28  ;;  %s345_s23 = scalar_lea.vmem [#allocation10], %s723_s29 }
  0x3a   : > { %498 = vmatpush.bf16.msra.mxu1 %v839_v2  ;;  %v837_v5 = vld [vmem:[#allocation7 + $0x28] sm:$0xff]  ;;  %v828_v6 = vld [vmem:[#allocation5 + $0x20] sm:$0xff]  ;;  %v827_v8 = vld [vmem:[#allocation5 + $0x18] sm:$0xff]  ;;  %s608_s18 = sshll.u32 %s345_s23, 4  ;;  %s596_s1 = scalar_lea.sflag [#allocation4], %s1278_s15  ;;  %s609_s18 = int_to_ptr.vmem [resolvable:$true] %s608_s18 }
  0x3b   : > { %v836_v7 = vld [vmem:[#allocation7 + $0x20] sm:$0xff]  ;;  %v835_v9 = vld [vmem:[#allocation7 + $0x18] sm:$0xff]  ;;  %v826_v10 = vld [vmem:[#allocation5 + $0x10] sm:$0xff]  ;;  %s1070_s28 = scalar_lea.hbm %s1347_s7, 16 }
  0x3c   : > { %v834_v11 = vld [vmem:[#allocation7 + $0x10] sm:$0xff]  ;;  %v825_v12 = vld [vmem:[#allocation5 + $0x8] sm:$0xff]  ;;  %v824_v13 = vld [vmem:[#allocation5] sm:$0xff] }
  0x3d   : > { %416 = vmatpush.bf16.msra.mxu0 %v830_v1  ;;  %v346_v14 = vld [vmem:[%s1282_s19] sm:$0xf]  ;;  %v833_v15 = vld [vmem:[#allocation7 + $0x8] sm:$0xff]  ;;  %v832_v16 = vld [vmem:[#allocation7] sm:$0xff]  ;;  %s610_s19 = sshll.u32 %s606_s17, 4  ;;  %s611_s19 = int_to_ptr.hbm [resolvable:$true] %s610_s19 }
  0x3e   : > { %499 = vmatpush.bf16.msra.mxu1 %v838_v3  ;;  %v847_v17 = vld [vmem:[#allocation8 + $0x38] sm:$0xff]  ;;  %v846_v18 = vld [vmem:[#allocation8 + $0x30] sm:$0xff]  ;;  %v845_v19 = vld [vmem:[#allocation8 + $0x28] sm:$0xff]  ;;  %s1064_s8 = sshra.s32 %s611_s19, 4  ;;  %s1065_s8 = int_to_ptr.hbm [resolvable:$true] %s1064_s8 }
  0x3f   : > { %581 = vmatpush.bf16.msra.mxu2 %v847_v17  ;;  %v844_v20 = vld [vmem:[#allocation8 + $0x20] sm:$0xff]  ;;  %v843_v21 = vld [vmem:[#allocation8 + $0x18] sm:$0xff]  ;;  %v842_v22 = vld [vmem:[#allocation8 + $0x10] sm:$0xff]  ;;  %s1066_s9 = scalar_lea.hbm %s1065_s8, 8  ;;  %p1071_p12 = scmp.lt.s32.totalorder %s1065_s8, %s1347_s7 }
  0x40   : > { %v927_v23 = vld [vmem:[%s1342_s2] ss:$0 sm:$0xff]  ;;  %v841_v29 = vld [vmem:[#allocation8 + $0x8] sm:$0xff]  ;;  %v840_v30 = vld [vmem:[#allocation8] sm:$0xff]  ;;  %p1067_p1 = scmp.ne.s32.totalorder %s1065_s8, %s1066_s9  ;;  %p1072_p8 = scmp.lt.s32.totalorder %s1070_s28, %s1066_s9 }
  0x41   : > { %417 = vmatpush.bf16.msra.mxu0 %v829_v4  ;;  %v928_v31 = vld [vmem:[%s1344_s4] ss:$0 sm:$0xff] }
  0x42   : > { %500 = vmatpush.bf16.msra.mxu1 %v837_v5  ;;  %v929_v37 = vld [vmem:[%s1346_s6] ss:$0 sm:$0xff]  ;;  %p1068_p3 = pnand %p1067_p1, %p1247_p13  ;;  %p1073_p7 = por %p1072_p8, %p1071_p12 }
  0x43   : > { %582 = vmatpush.bf16.msra.mxu2 %v846_v18 }
  0x44   : > { %p1069_p5 = pneg %p1068_p3 }
  0x45   : > { %418 = vmatpush.bf16.msra.mxu0 %v828_v6 }
  0x46   : > { %501 = vmatpush.bf16.msra.mxu1 %v836_v7  ;;  %p1074_p9 = pnand %p1073_p7, %p1069_p5 }
  0x47   : > { %583 = vmatpush.bf16.msra.mxu2 %v845_v19 }
  0x49   : > { %419 = vmatpush.bf16.msra.mxu0 %v827_v8 }
  0x4a   : > { %502 = vmatpush.bf16.msra.mxu1 %v835_v9 }
  0x4b   : > { %584 = vmatpush.bf16.msra.mxu2 %v844_v20 }
  0x4d   : > { %420 = vmatpush.bf16.msra.mxu0 %v826_v10 }
  0x4e   : > { %503 = vmatpush.bf16.msra.mxu1 %v834_v11 }
  0x4f   : > { %585 = vmatpush.bf16.msra.mxu2 %v843_v21 }
  0x51   : > { %421 = vmatpush.bf16.msra.mxu0 %v825_v12 }
  0x52   : > { %504 = vmatpush.bf16.msra.mxu1 %v833_v15 }
  0x53   : > { %586 = vmatpush.bf16.msra.mxu2 %v842_v22 }
  0x55   : > { %422 = vmatpush.bf16.msra.mxu0 %v824_v13 }
  0x56   : > { %505 = vmatpush.bf16.msra.mxu1 %v832_v16 }
  0x57   : > { %587 = vmatpush.bf16.msra.mxu2 %v841_v29 }
  0x58   : > { %423 = vmatmul.bf16.vlgmr.msra.gmra.mxu0 %v346_v14 }
  0x5b   : > { %588 = vmatpush.bf16.msra.mxu2 %v840_v30 }
  0xd5   : > { %v424_v24 = vpop.f32.mrf.mxu0 }
  0xd6   : > { %v425_v25 = vadd.f32 %v927_v23, %v424_v24 }
  0xd8   : > { %v428_v26 = vmax.f32 %v425_v25, 0.0 }
  0xda   : > { %v446_v27 = vpack.c.bf16 %v428_v26, %v428_v26 }
  0xdc   : > { %506 = vmatmul.bf16.vlgmr.msra.gmra.mxu1 %v446_v27 }
  0xdd   : > { %v426_v28 = vpop.f32.mrf.mxu0 }
 0x159   : > { %v507_v32 = vpop.f32.mrf.mxu1 }
 0x15a   : > { %v508_v33 = vadd.f32 %v928_v31, %v507_v32 }
 0x15c   : > { %v511_v34 = vmax.f32 %v508_v33, 0.0 }
 0x15e   : > { %v529_v35 = vpack.c.bf16 %v511_v34, %v511_v34 }
 0x160   : > { %589 = vmatmul.bf16.vlgmr.msra.gmra.mxu2 %v529_v35 }
 0x161   : > { %v509_v36 = vpop.f32.mrf.mxu1 }
 0x1e3   : > { %v590_v38 = vpop.f32.mrf.mxu2 }
 0x1e4   : > { %v591_v39 = vadd.f32 %v929_v37, %v590_v38 }
 0x1e6   : > { %594 = vst [vmem:[%s345_s23] sm:$0xff] %v591_v39 }
 0x1e7   : > { %1077 = shalt.err (!%p1074_p9)
}
 0x1e8   : > { %862 = dma.vmem_to_hbm [thread:$0]  (%p1247_p13), %s609_s18, 128, %s611_s19, %s596_s1  }
 0x1eb   : > { %v592_v40 = vpop.f32.mrf.mxu2 }
 0x1ec PF: > { %s622_s15 = sand.u32 1, %s1112_s24   ;;  %p1356_p10 = scmp.ge.s32.totalorder %s1124_s27, 2 }
 0x1ed   : > { %s623_s30 = scalar_lea.sflag [#allocation4], %s622_s15 }
 0x1ee   : > { %p879_p11 = pnand %p1356_p10, %p1252_p4 }
 0x1f0   : > { %p880_p0 = pneg %p879_p11 }
 0x1f2   : > { %1107 = dma.done.wait (%p880_p0), %s623_s30, 128  }
 0x1f3   : > { %1109 = vsyncadd (%p880_p0), %s623_s30, 4294967168  ;;  %p22_p2 = scmp.ge.s32.totalorder %s1227_s10, 4   ;;  %s1357_s24 = smov %s1116_s25 }
 0x1f4   : > { %s1358_s25 = smov %s1120_s26  ;;  %s1359_s26 = smov %s1239_s11 }
 0x1f5   : > { %s1360_s27 = smov %s1227_s10  ;;  %24 = sbr.rel (!%p22_p2) target bundleno = 9 (0x9), region = 105 }
 0x1fa   :  { %629 = vsyncpa [#allocation3], 1 }
 0x1fb   :  { %631 = vsyncpa [#allocation3 + $0x1], 1 }
 0x1fc   :  { %632 = vsyncpa [#allocation6], 1 }
 0x1fd   :  { %633 = vsyncpa [#allocation9], 1 }
 0x1fe   :  { %634 = vsyncpa [#allocation4], 1 }
 0x1ff   :  { %636 = vsyncpa [#allocation4 + $0x1], 1 }

// kernel: tpu_custom_call.1
= control target key start
LH: loop header
LB: loop body
LE: loop exit
PB: predicated region body
PF: predicated region fallthrough
CT: control target
= control target key end

     0   :  { %s1340_s0 = inlined_call_operand.hbm [shape: bf16[16,128], index: 0, kind: input, shape index: {}]   ;;  %s1341_s1 = inlined_call_operand.hbm [shape: bf16[128,128], index: 1, kind: input, shape index: {}]   ;;  %s1342_s2 = inlined_call_operand.vmem [shape: f32[1,128], index: 2, kind: input, shape index: {}]   ;;  %s1343_s3 = inlined_call_operand.hbm [shape: bf16[128,128], index: 3, kind: input, shape index: {}]   ;;  %s1344_s4 = inlined_call_operand.vmem [shape: f32[1,128], index: 4, kind: input, shape index: {}]   ;;  %s1345_s5 = inlined_call_operand.hbm [shape: bf16[128,128], index: 5, kind: input, shape index: {}]   ;;  %s1346_s6 = inlined_call_operand.vmem [shape: f32[1,128], index: 6, kind: input, shape index: {}]   ;;  %s1347_s7 = inlined_call_operand.hbm [shape: f32[16,128], index: 7, kind: output, shape index: {}]  }
   0x1   :  { %1348 = sst [smem:[#allocation15_spill]] %s1341_s1 }
   0x2   :  { %12 = vsyncpa [#allocation3], 0 }
   0x3   :  { %14 = vsyncpa [#allocation3 + $0x1], 0 }
   0x4   :  { %15 = vsyncpa [#allocation6], 0 }
   0x5   :  { %16 = vsyncpa [#allocation9], 0 }
   0x6   :  { %17 = vsyncpa [#allocation4], 0 }
   0x7   :  { %19 = vsyncpa [#allocation4 + $0x1], 0  ;;  %s1171_s24 = smov 0   ;;  %s1173_s25 = smov 0  }
   0x8   :  { %s1175_s26 = smov 0   ;;  %s1177_s27 = smov 0  }
   0x9 LB: > { %s1349_s1 = sld [smem:[#allocation15_spill]]  ;;  %s1195_s8 = sadd.s32 4294967295, %s1124_s27   ;;  %s1124_s27 = sphi %s1177_s27, %s1360_s27   ;;  %s1120_s26 = sphi %s1175_s26, %s1359_s26   ;;  %s1116_s25 = sphi %s1173_s25, %s1358_s25   ;;  %s1112_s24 = sphi %s1171_s24, %s1357_s24  }
   0xa   : > { %p711_p0 = scmp.ge.s32.totalorder %s1124_s27, 1  ;;  %p46_p1 = scmp.eq.s32.totalorder %s1195_s8, 0 }
   0xb   : > { %p208_p2 = scmp.lt.s32.totalorder %s1124_s27, 3  ;;  %s1126_s10 = smov [#allocation5]  }
   0xc   : > { %s221_s11 = sshll.u32 %s1126_s10, 4  ;;  %s236_s14 = sshll.u32 %s1343_s3, 4  ;;  %s222_s11 = int_to_ptr.vmem [resolvable:$true] %s221_s11  ;;  %s237_s14 = int_to_ptr.hbm [resolvable:$true] %s236_s14 }
   0xd   : > { %p1200_p3 = pnand %p711_p0, %p208_p2  ;;  %s253_s18 = sshll.u32 %s1345_s5, 4  ;;  %s254_s18 = int_to_ptr.hbm [resolvable:$true] %s253_s18 }
   0xe   : > { %s1127_s19 = smov [#allocation7]   ;;  %s1128_s21 = smov 64  }
   0xf   : > { %s219_s30 = sshll.u32 %s1349_s1, 4  ;;  %p864_p4 = pneg %p1200_p3  ;;  %s220_s30 = int_to_ptr.hbm [resolvable:$true] %s219_s30 }
  0x10   : > { %s238_s20 = sshll.u32 %s1127_s19, 4  ;;  %s1129_s22 = smov 4   ;;  %s239_s20 = int_to_ptr.vmem [resolvable:$true] %s238_s20 }
  0x11   : > { %p1212_p6 = pnand %p864_p4, %p46_p1  ;;  %s1130_s23 = smov [#allocation8]  }
  0x12   : > { %s255_s28 = sshll.u32 %s1130_s23, 4  ;;  %s710_s29 = sadd.s32 4294967294, %s1124_s27   ;;  %s256_s28 = int_to_ptr.vmem [resolvable:$true] %s255_s28 }
  0x13   : > { %867 = dma.hbm_to_vmem [thread:$0]  (!%p1212_p6), %s220_s30, 1024, %s222_s11, [#allocation6], %s1128_s21, %s1128_s21, %s1129_s22  }
  0x14   : > { %870 = dma.hbm_to_vmem [thread:$0]  (!%p1212_p6), %s237_s14, 1024, %s239_s20, [#allocation6], %s1128_s21, %s1128_s21, %s1129_s22  }
  0x15   : > { %873 = dma.hbm_to_vmem [thread:$0]  (!%p1212_p6), %s254_s18, 1024, %s256_s28, [#allocation9], %s1128_s21, %s1128_s21, %s1129_s22  }
  0x16   : > { %s1227_s10 = sadd.s32 1, %s1124_s27   ;;  %s32_s12 = sadd.s32 1, %s1120_s26 }
  0x17   : > { %s29_s30 = ssub.s32 %s1124_s27, %s1227_s10  ;;  %p39_p7 = scmp.ne.s32.totalorder %s1120_s26, %s1116_s25 }
  0x18   : > { %p30_p8 = scmp.eq.s32.totalorder %s29_s30, 0  ;;  %p40_p9 = scmp.eq.s32.totalorder %s1124_s27, 0 }
  0x19   : > { %p45_p10 = scmp.ne.s32.totalorder %s1116_s25, %s1112_s24  ;;  %p195_p11 = scmp.eq.s32.totalorder %s1195_s8, 1 }
  0x1a   : > { %s1239_s11 = scalar_select %p30_p8, %s1120_s26, %s32_s12  }
  0x1b   : > { %p1243_p12 = por %p46_p1, %p45_p10  ;;  %p1247_p13 = por %p195_p11, %p39_p7 }
  0x1c   : > { %p201_p0 = scmp.eq.s32.totalorder %s710_s29, 1  ;;  %p41_p2 = por %p40_p9, %p39_p7 }
  0x1d   : > { %s272_s15 = sand.u32 1, %s1120_s26   ;;  %p885_p6 = scmp.lt.s32.totalorder %s1124_s27, 2 }
  0x1e   : > { %p1252_p4 = por %p201_p0, %p45_p10  ;;  %s716_s17 = sshll.u32 %s272_s15, 2 }
  0x1f   : > { %s717_s18 = sshll.u32 %s1124_s27, 2  ;;  %s276_s23 = scalar_lea.vmem [#allocation2], %s716_s17 }
  0x20   : > { %s280_s21 = scalar_lea.hbm %s1340_s0, %s717_s18  ;;  %s284_s28 = sshll.u32 %s276_s23, 4  ;;  %s285_s28 = int_to_ptr.vmem [resolvable:$true] %s284_s28 }
  0x21   : > { %s282_s22 = sshll.u32 %s280_s21, 4  ;;  %p1261_p8 = pnand %p885_p6, %p41_p2  ;;  %s283_s22 = int_to_ptr.hbm [resolvable:$true] %s282_s22 }
  0x22   : > { %s273_s12 = scalar_lea.sflag [#allocation3], %s272_s15  ;;  %s1020_s30 = sshra.s32 %s283_s22, 4  ;;  %s1021_s30 = int_to_ptr.hbm [resolvable:$true] %s1020_s30 }
  0x23   : > { %s1022_s1 = scalar_lea.hbm %s1021_s30, 4  ;;  %p1024_p9 = pneg %p1261_p8 }
  0x24   : > { %p1023_p7 = scmp.ne.s32.totalorder %s1021_s30, %s1022_s1  ;;  %s1027_s17 = scalar_lea.hbm %s1340_s0, 8 }
  0x25   : > { %p1028_p0 = scmp.lt.s32.totalorder %s1021_s30, %s1340_s0  ;;  %p1029_p2 = scmp.lt.s32.totalorder %s1027_s17, %s1022_s1 }
  0x26   : > { %p1025_p10 = pnand %p1024_p9, %p1023_p7 }
  0x27   : > { %p1030_p6 = por %p1029_p2, %p1028_p0 }
  0x28   : > { %p1026_p11 = pneg %p1025_p10 }
  0x2a   : > { %p1031_p5 = pnand %p1030_p6, %p1026_p11 }
  0x2c   : > { %1034 = shalt.err (!%p1031_p5)
}
  0x2d   : > { %877 = dma.hbm_to_vmem [thread:$0]  (!%p1261_p8), %s283_s22, 64, %s285_s28, %s273_s12  }
  0x2e   : > { %293 = sbr.rel (%p1200_p3) target bundleno = 492 (0x1ec), region = 48  ;;  %s1278_s15 = sand.u32 (!%p1200_p3), 1, %s1116_s25  }
  0x2f   : > { %s719_s23 = sshll.u32 (!%p1200_p3), %s1278_s15, 2  ;;  %s296_s18 = scalar_lea.sflag (!%p1200_p3), [#allocation3], %s1278_s15 }
  0x30   : > { %s1282_s19 = scalar_lea.vmem (!%p1200_p3), [#allocation2], %s719_s23 }
  0x33   : > { %1095 = dma.done.wait (%p1243_p12), %s296_s18, 64  }
  0x34   : > { %1097 = vsyncadd (%p1243_p12), %s296_s18, 4294967232 }
  0x35   : > { %1099 = dma.done.wait (%p46_p1), [#allocation6], 2048  }
  0x36   : > { %1101 = vsyncadd (%p46_p1), [#allocation6], 4294965248 }
  0x37   : > { %1103 = dma.done.wait (%p46_p1), [#allocation9], 1024  }
  0x38   : > { %1105 = vsyncadd (%p46_p1), [#allocation9], 4294966272  ;;  %v831_v0 = vld [vmem:[#allocation5 + $0x38] sm:$0xff]  ;;  %v830_v1 = vld [vmem:[#allocation5 + $0x30] sm:$0xff]  ;;  %s821_s28 = sshll.u32 %s1195_s8, 3  ;;  %s723_s29 = sshll.u32 %s1278_s15, 3 }
  0x39   : > { %415 = vmatpush.bf16.msra.mxu0 %v831_v0  ;;  %v839_v2 = vld [vmem:[#allocation7 + $0x38] sm:$0xff]  ;;  %v838_v3 = vld [vmem:[#allocation7 + $0x30] sm:$0xff]  ;;  %v829_v4 = vld [vmem:[#allocation5 + $0x28] sm:$0xff]  ;;  %s606_s17 = scalar_lea.hbm %s1347_s7, %s821_s28  ;;  %s345_s23 = scalar_lea.vmem [#allocation10], %s723_s29 }
  0x3a   : > { %498 = vmatpush.bf16.msra.mxu1 %v839_v2  ;;  %v837_v5 = vld [vmem:[#allocation7 + $0x28] sm:$0xff]  ;;  %v828_v6 = vld [vmem:[#allocation5 + $0x20] sm:$0xff]  ;;  %v827_v8 = vld [vmem:[#allocation5 + $0x18] sm:$0xff]  ;;  %s608_s18 = sshll.u32 %s345_s23, 4  ;;  %s596_s1 = scalar_lea.sflag [#allocation4], %s1278_s15  ;;  %s609_s18 = int_to_ptr.vmem [resolvable:$true] %s608_s18 }
  0x3b   : > { %v836_v7 = vld [vmem:[#allocation7 + $0x20] sm:$0xff]  ;;  %v835_v9 = vld [vmem:[#allocation7 + $0x18] sm:$0xff]  ;;  %v826_v10 = vld [vmem:[#allocation5 + $0x10] sm:$0xff]  ;;  %s1070_s28 = scalar_lea.hbm %s1347_s7, 16 }
  0x3c   : > { %v834_v11 = vld [vmem:[#allocation7 + $0x10] sm:$0xff]  ;;  %v825_v12 = vld [vmem:[#allocation5 + $0x8] sm:$0xff]  ;;  %v824_v13 = vld [vmem:[#allocation5] sm:$0xff] }
  0x3d   : > { %416 = vmatpush.bf16.msra.mxu0 %v830_v1  ;;  %v346_v14 = vld [vmem:[%s1282_s19] sm:$0xf]  ;;  %v833_v15 = vld [vmem:[#allocation7 + $0x8] sm:$0xff]  ;;  %v832_v16 = vld [vmem:[#allocation7] sm:$0xff]  ;;  %s610_s19 = sshll.u32 %s606_s17, 4  ;;  %s611_s19 = int_to_ptr.hbm [resolvable:$true] %s610_s19 }
  0x3e   : > { %499 = vmatpush.bf16.msra.mxu1 %v838_v3  ;;  %v847_v17 = vld [vmem:[#allocation8 + $0x38] sm:$0xff]  ;;  %v846_v18 = vld [vmem:[#allocation8 + $0x30] sm:$0xff]  ;;  %v845_v19 = vld [vmem:[#allocation8 + $0x28] sm:$0xff]  ;;  %s1064_s8 = sshra.s32 %s611_s19, 4  ;;  %s1065_s8 = int_to_ptr.hbm [resolvable:$true] %s1064_s8 }
  0x3f   : > { %581 = vmatpush.bf16.msra.mxu2 %v847_v17  ;;  %v844_v20 = vld [vmem:[#allocation8 + $0x20] sm:$0xff]  ;;  %v843_v21 = vld [vmem:[#allocation8 + $0x18] sm:$0xff]  ;;  %v842_v22 = vld [vmem:[#allocation8 + $0x10] sm:$0xff]  ;;  %s1066_s9 = scalar_lea.hbm %s1065_s8, 8  ;;  %p1071_p12 = scmp.lt.s32.totalorder %s1065_s8, %s1347_s7 }
  0x40   : > { %v927_v23 = vld [vmem:[%s1342_s2] ss:$0 sm:$0xff]  ;;  %v841_v29 = vld [vmem:[#allocation8 + $0x8] sm:$0xff]  ;;  %v840_v30 = vld [vmem:[#allocation8] sm:$0xff]  ;;  %p1067_p1 = scmp.ne.s32.totalorder %s1065_s8, %s1066_s9  ;;  %p1072_p8 = scmp.lt.s32.totalorder %s1070_s28, %s1066_s9 }
  0x41   : > { %417 = vmatpush.bf16.msra.mxu0 %v829_v4  ;;  %v928_v31 = vld [vmem:[%s1344_s4] ss:$0 sm:$0xff] }
  0x42   : > { %500 = vmatpush.bf16.msra.mxu1 %v837_v5  ;;  %v929_v37 = vld [vmem:[%s1346_s6] ss:$0 sm:$0xff]  ;;  %p1068_p3 = pnand %p1067_p1, %p1247_p13  ;;  %p1073_p7 = por %p1072_p8, %p1071_p12 }
  0x43   : > { %582 = vmatpush.bf16.msra.mxu2 %v846_v18 }
  0x44   : > { %p1069_p5 = pneg %p1068_p3 }
  0x45   : > { %418 = vmatpush.bf16.msra.mxu0 %v828_v6 }
  0x46   : > { %501 = vmatpush.bf16.msra.mxu1 %v836_v7  ;;  %p1074_p9 = pnand %p1073_p7, %p1069_p5 }
  0x47   : > { %583 = vmatpush.bf16.msra.mxu2 %v845_v19 }
  0x49   : > { %419 = vmatpush.bf16.msra.mxu0 %v827_v8 }
  0x4a   : > { %502 = vmatpush.bf16.msra.mxu1 %v835_v9 }
  0x4b   : > { %584 = vmatpush.bf16.msra.mxu2 %v844_v20 }
  0x4d   : > { %420 = vmatpush.bf16.msra.mxu0 %v826_v10 }
  0x4e   : > { %503 = vmatpush.bf16.msra.mxu1 %v834_v11 }
  0x4f   : > { %585 = vmatpush.bf16.msra.mxu2 %v843_v21 }
  0x51   : > { %421 = vmatpush.bf16.msra.mxu0 %v825_v12 }
  0x52   : > { %504 = vmatpush.bf16.msra.mxu1 %v833_v15 }
  0x53   : > { %586 = vmatpush.bf16.msra.mxu2 %v842_v22 }
  0x55   : > { %422 = vmatpush.bf16.msra.mxu0 %v824_v13 }
  0x56   : > { %505 = vmatpush.bf16.msra.mxu1 %v832_v16 }
  0x57   : > { %587 = vmatpush.bf16.msra.mxu2 %v841_v29 }
  0x58   : > { %423 = vmatmul.bf16.vlgmr.msra.gmra.mxu0 %v346_v14 }
  0x5b   : > { %588 = vmatpush.bf16.msra.mxu2 %v840_v30 }
  0xd5   : > { %v424_v24 = vpop.f32.mrf.mxu0 }
  0xd6   : > { %v425_v25 = vadd.f32 %v927_v23, %v424_v24 }
  0xd8   : > { %v428_v26 = vmax.f32 %v425_v25, 0.0 }
  0xda   : > { %v446_v27 = vpack.c.bf16 %v428_v26, %v428_v26 }
  0xdc   : > { %506 = vmatmul.bf16.vlgmr.msra.gmra.mxu1 %v446_v27 }
  0xdd   : > { %v426_v28 = vpop.f32.mrf.mxu0 }
 0x159   : > { %v507_v32 = vpop.f32.mrf.mxu1 }
 0x15a   : > { %v508_v33 = vadd.f32 %v928_v31, %v507_v32 }
 0x15c   : > { %v511_v34 = vmax.f32 %v508_v33, 0.0 }
 0x15e   : > { %v529_v35 = vpack.c.bf16 %v511_v34, %v511_v34 }
 0x160   : > { %589 = vmatmul.bf16.vlgmr.msra.gmra.mxu2 %v529_v35 }
 0x161   : > { %v509_v36 = vpop.f32.mrf.mxu1 }
 0x1e3   : > { %v590_v38 = vpop.f32.mrf.mxu2 }
 0x1e4   : > { %v591_v39 = vadd.f32 %v929_v37, %v590_v38 }
 0x1e6   : > { %594 = vst [vmem:[%s345_s23] sm:$0xff] %v591_v39 }
 0x1e7   : > { %1077 = shalt.err (!%p1074_p9)
}
 0x1e8   : > { %862 = dma.vmem_to_hbm [thread:$0]  (%p1247_p13), %s609_s18, 128, %s611_s19, %s596_s1  }
 0x1eb   : > { %v592_v40 = vpop.f32.mrf.mxu2 }
 0x1ec PF: > { %s622_s15 = sand.u32 1, %s1112_s24   ;;  %p1356_p10 = scmp.ge.s32.totalorder %s1124_s27, 2 }
 0x1ed   : > { %s623_s30 = scalar_lea.sflag [#allocation4], %s622_s15 }
 0x1ee   : > { %p879_p11 = pnand %p1356_p10, %p1252_p4 }
 0x1f0   : > { %p880_p0 = pneg %p879_p11 }
 0x1f2   : > { %1107 = dma.done.wait (%p880_p0), %s623_s30, 128  }
 0x1f3   : > { %1109 = vsyncadd (%p880_p0), %s623_s30, 4294967168  ;;  %p22_p2 = scmp.ge.s32.totalorder %s1227_s10, 4   ;;  %s1357_s24 = smov %s1116_s25 }
 0x1f4   : > { %s1358_s25 = smov %s1120_s26  ;;  %s1359_s26 = smov %s1239_s11 }
 0x1f5   : > { %s1360_s27 = smov %s1227_s10  ;;  %24 = sbr.rel (!%p22_p2) target bundleno = 9 (0x9), region = 105 }
 0x1fa   :  { %629 = vsyncpa [#allocation3], 1 }
 0x1fb   :  { %631 = vsyncpa [#allocation3 + $0x1], 1 }
 0x1fc   :  { %632 = vsyncpa [#allocation6], 1 }
 0x1fd   :  { %633 = vsyncpa [#allocation9], 1 }
 0x1fe   :  { %634 = vsyncpa [#allocation4], 1 }
 0x1ff   :  { %636 = vsyncpa [#allocation4 + $0x1], 1 }

</bundles_post_ra>
